<compile_context>
chip_gen: v6e
topology: v6e:2x2x1
jax: 0.10.0
libtpu: 0.0.40
codegen_flags: <defaults>
</compile_context>

<pallas_src>
import jax
import jax.numpy as jnp
from jax.experimental import pallas as pl
from jax.experimental.pallas import tpu as pltpu


def _mlp_kernel(x_ref,
                w1_ref, b1_ref,
                w2_ref, b2_ref,
                w3_ref, b3_ref,
                w4_ref, b4_ref,
                o_ref):
    # Whole forward pass for one lane tile, batch on lanes, f32 accumulation.
    x = x_ref[...]                                                # (F, tile_b)

    h = jnp.dot(w1_ref[...], x, preferred_element_type=jnp.float32) + b1_ref[...]
    h = jnp.maximum(h, 0.0)                                       # (44, tile_b)

    h = jnp.dot(w2_ref[...], h, preferred_element_type=jnp.float32) + b2_ref[...]
    h = jnp.maximum(h, 0.0)                                       # (22, tile_b)

    h = jnp.dot(w3_ref[...], h, preferred_element_type=jnp.float32) + b3_ref[...]
    h = jnp.maximum(h, 0.0)                                       # (11, tile_b)

    out = jnp.dot(w4_ref[...], h, preferred_element_type=jnp.float32) + b4_ref[...]
    o_ref[...] = out.astype(o_ref.dtype)                          # (1, tile_b)


def _cdiv(a, b):
    return -(-a // b)


def _round_up(a, b):
    return _cdiv(a, b) * b


def _auto_tile_b(B, F):
    """Largest lane tile (batch columns) that fits a conservative VMEM budget."""
    budget = 12 * 1024 * 1024          # safe under v5e/v6e 16/32 MiB scoped and
                                       # v7x 32 MiB scoped / 64 MiB physical
    f_pad = _round_up(F, 8)            # sublane padding of the (F, tile_b) x tile
    act_sublanes = sum(_round_up(n, 8) for n in (44, 22, 11, 1))  # 48+24+16+8

    def vmem_need(t):
        x_db = 2 * f_pad * t * 4       # double-buffered x tile
        out_db = 2 * 8 * t * 4         # double-buffered (1, t) f32 out (8-sublane pad)
        acts = act_sublanes * t * 4    # sublane-padded hidden activations
        return x_db + out_db + acts

    tile = 16384                       # big lane tiles amortize ~0.35us/step overhead
    while tile > 512 and vmem_need(tile) > budget:
        tile //= 2

    # Don't tile past the batch itself; keep the lane dim a multiple of 512 when
    # it gets that big (full 256-wide MXU N-slabs on v6e/v7x), else 128.
    quantum = 512 if B >= 512 else 128
    tile = min(tile, _round_up(B, quantum))

    # v7x megacore: when the batch is large, prefer >= 2 tiles so both
    # TensorCores get work; the extra split is harmless noise on v5e/v6e.
    if B >= 2 * 512 and _cdiv(B, tile) < 2:
        tile = _round_up(_cdiv(B, 2), quantum)

    return max(tile, 128)


def dnn_regressor_forward(x, params, *, tile_b=None):
    """x: (B, input_size) f32.
    params: PyTorch-native (out, in) weights and (out, 1) biases.
    """
    B, F = x.shape
    if tile_b is None:
        tile_b = _auto_tile_b(B, F)
    assert tile_b % 128 == 0, "tile_b must be a multiple of 128 (lane constraint)"

    num_tiles = _cdiv(B, tile_b)
    b_pad = num_tiles * tile_b

    # Batch -> lane axis. Single wrapper-side layout pass (transpose + tail
    # zero-pad fuse into one copy); padded columns are computed and sliced off.
    x_t = jnp.transpose(x)                         # (F, B)
    if b_pad != B:
        x_t = jnp.pad(x_t, ((0, 0), (0, b_pad - B)))

    w1, b1 = params["w1"], params["b1"]            # (44, F),  (44, 1)
    w2, b2 = params["w2"], params["b2"]            # (22, 44), (22, 1)
    w3, b3 = params["w3"], params["b3"]            # (11, 22), (11, 1)
    w4, b4 = params["w4"], params["b4"]            # (1, 11),  (1, 1)

    def full(arr):
        # Tiny, grid-invariant operands: whole array, constant index_map
        # (DMA'd once by the pipeliner).
        return pl.BlockSpec(arr.shape, lambda i, _n=arr.ndim: (0,) * _n)

    out = pl.pallas_call(
        _mlp_kernel,
        out_shape=jax.ShapeDtypeStruct((1, b_pad), jnp.float32),
        grid_spec=pltpu.PrefetchScalarGridSpec(
            num_scalar_prefetch=0,
            grid=(num_tiles,),
            in_specs=[
                pl.BlockSpec((F, tile_b), lambda i: (0, i)),
                full(w1), full(b1),
                full(w2), full(b2),
                full(w3), full(b3),
                full(w4), full(b4),
            ],
            # Batch on lanes; sublane dim (1) is the full array extent.
            out_specs=pl.BlockSpec((1, tile_b), lambda i: (0, i)),
        ),
        compiler_params=pltpu.CompilerParams(
            dimension_semantics=("parallel",)),
    )(x_t, w1, b1, w2, b2, w3, b3, w4, b4)

    # (1, b_pad) -> (B, 1): pure view reshape + slice.
    return out.reshape(b_pad, 1)[:B]


def init_params(key, input_size):
    """Deterministic synthetic params, PyTorch-Linear native (out, in) shapes."""
    sizes = [(44, input_size), (22, 44), (11, 22), (1, 11)]
    params = {}
    for idx, (fout, fin) in enumerate(sizes, start=1):
        key, kw, kb = jax.random.split(key, 3)
        bound = 1.0 / jnp.sqrt(fin)
        params[f"w{idx}"] = jax.random.uniform(
            kw, (fout, fin), jnp.float32, -bound, bound)
        params[f"b{idx}"] = jax.random.uniform(
            kb, (fout, 1), jnp.float32, -bound, bound)
    return params


def reference_forward(x, p):
    h = jnp.maximum(x @ p["w1"].T + p["b1"].T, 0.0)
    h = jnp.maximum(h @ p["w2"].T + p["b2"].T, 0.0)
    h = jnp.maximum(h @ p["w3"].T + p["b3"].T, 0.0)
    return h @ p["w4"].T + p["b4"].T


if __name__ == "__main__":
    key = jax.random.PRNGKey(0)
    k_x, k_x2, k_x3, k_p = jax.random.split(key, 4)

    input_size = 16
    params = init_params(k_p, input_size)

    # Small, multiple-of-8 batch (single tile).
    x = jax.random.normal(k_x, (16, input_size), jnp.float32)
    out = jax.block_until_ready(dnn_regressor_forward(x, params))
    ref = reference_forward(x, params)
    assert out.shape == (16, 1)
    assert jnp.allclose(out, ref, atol=1e-5, rtol=1e-5), "mismatch vs JAX reference"

    # Ragged batch exercising the cdiv + tail zero-pad path.
    x2 = jax.random.normal(k_x2, (19, input_size), jnp.float32)
    out2 = jax.block_until_ready(dnn_regressor_forward(x2, params))
    ref2 = reference_forward(x2, params)
    assert out2.shape == (19, 1)
    assert jnp.allclose(out2, ref2, atol=1e-5, rtol=1e-5), "ragged-batch mismatch"

    # Multi-tile grid path (explicit small tile to exercise num_tiles > 1).
    x3 = jax.random.normal(k_x3, (300, input_size), jnp.float32)
    out3 = jax.block_until_ready(dnn_regressor_forward(x3, params, tile_b=128))
    ref3 = reference_forward(x3, params)
    assert out3.shape == (300, 1)
    assert jnp.allclose(out3, ref3, atol=1e-5, rtol=1e-5), "multi-tile mismatch"

    print("KERNEL_OK")
</pallas_src>

<mosaic_0001>
module attributes {stable_mosaic.version = 11 : i64} {
  func.func @_mlp_kernel(%arg0: i32, %arg1: memref<16x128xf32, #tpu.memory_space<vmem>>, %arg2: memref<44x16xf32, #tpu.memory_space<vmem>>, %arg3: memref<44x1xf32, #tpu.memory_space<vmem>>, %arg4: memref<22x44xf32, #tpu.memory_space<vmem>>, %arg5: memref<22x1xf32, #tpu.memory_space<vmem>>, %arg6: memref<11x22xf32, #tpu.memory_space<vmem>>, %arg7: memref<11x1xf32, #tpu.memory_space<vmem>>, %arg8: memref<1x11xf32, #tpu.memory_space<vmem>>, %arg9: memref<1x1xf32, #tpu.memory_space<vmem>>, %arg10: memref<1x128xf32, #tpu.memory_space<vmem>>) attributes {dimension_semantics = [#tpu.dimension_semantics<parallel>], iteration_bounds = array<i64: 1>, scalar_prefetch = 0 : i64, scratch_operands = 0 : i64, tpu.core_type = #tpu.core_type<tc>, window_params = [{transform_indices = @transform_0, window_bounds = array<i64: 16, 128>}, {pipeline_mode = #tpu.pipeline_mode<synchronous>, transform_indices = @transform_1, window_bounds = array<i64: 44, 16>}, {pipeline_mode = #tpu.pipeline_mode<synchronous>, transform_indices = @transform_2, window_bounds = array<i64: 44, 1>}, {pipeline_mode = #tpu.pipeline_mode<synchronous>, transform_indices = @transform_3, window_bounds = array<i64: 22, 44>}, {pipeline_mode = #tpu.pipeline_mode<synchronous>, transform_indices = @transform_4, window_bounds = array<i64: 22, 1>}, {pipeline_mode = #tpu.pipeline_mode<synchronous>, transform_indices = @transform_5, window_bounds = array<i64: 11, 22>}, {pipeline_mode = #tpu.pipeline_mode<synchronous>, transform_indices = @transform_6, window_bounds = array<i64: 11, 1>}, {pipeline_mode = #tpu.pipeline_mode<synchronous>, transform_indices = @transform_7, window_bounds = array<i64: 1, 11>}, {pipeline_mode = #tpu.pipeline_mode<synchronous>, transform_indices = @transform_8, window_bounds = array<i64: 1, 1>}, {transform_indices = @transform_9, window_bounds = array<i64: 1, 128>}]} {
    %c0 = arith.constant 0 : index
    %c0_0 = arith.constant 0 : index
    %0 = vector.load %arg1[%c0, %c0_0] : memref<16x128xf32, #tpu.memory_space<vmem>>, vector<16x128xf32>
    %c0_1 = arith.constant 0 : index
    %c0_2 = arith.constant 0 : index
    %1 = vector.load %arg2[%c0_1, %c0_2] : memref<44x16xf32, #tpu.memory_space<vmem>>, vector<44x16xf32>
    %cst = arith.constant dense<0.000000e+00> : vector<44x128xf32>
    %2 = tpu.matmul %1, %0, %cst {dimension_numbers = #tpu.dot_dimension_numbers<[1], [0], [0], [1], [0, 0, 1, 1], [], []>} : vector<44x16xf32>, vector<16x128xf32>, vector<44x128xf32> -> vector<44x128xf32>
    %c0_3 = arith.constant 0 : index
    %c0_4 = arith.constant 0 : index
    %3 = vector.load %arg3[%c0_3, %c0_4] : memref<44x1xf32, #tpu.memory_space<vmem>>, vector<44x1xf32>
    %4 = vector.broadcast %3 : vector<44x1xf32> to vector<44x128xf32>
    %5 = arith.addf %2, %4 : vector<44x128xf32>
    %cst_5 = arith.constant 0.000000e+00 : f32
    %6 = vector.broadcast %cst_5 : f32 to vector<44x128xf32>
    %7 = arith.maximumf %5, %6 : vector<44x128xf32>
    %c0_6 = arith.constant 0 : index
    %c0_7 = arith.constant 0 : index
    %8 = vector.load %arg4[%c0_6, %c0_7] : memref<22x44xf32, #tpu.memory_space<vmem>>, vector<22x44xf32>
    %cst_8 = arith.constant dense<0.000000e+00> : vector<22x128xf32>
    %9 = tpu.matmul %8, %7, %cst_8 {dimension_numbers = #tpu.dot_dimension_numbers<[1], [0], [0], [1], [0, 0, 1, 1], [], []>} : vector<22x44xf32>, vector<44x128xf32>, vector<22x128xf32> -> vector<22x128xf32>
    %c0_9 = arith.constant 0 : index
    %c0_10 = arith.constant 0 : index
    %10 = vector.load %arg5[%c0_9, %c0_10] : memref<22x1xf32, #tpu.memory_space<vmem>>, vector<22x1xf32>
    %11 = vector.broadcast %10 : vector<22x1xf32> to vector<22x128xf32>
    %12 = arith.addf %9, %11 : vector<22x128xf32>
    %cst_11 = arith.constant 0.000000e+00 : f32
    %13 = vector.broadcast %cst_11 : f32 to vector<22x128xf32>
    %14 = arith.maximumf %12, %13 : vector<22x128xf32>
    %c0_12 = arith.constant 0 : index
    %c0_13 = arith.constant 0 : index
    %15 = vector.load %arg6[%c0_12, %c0_13] : memref<11x22xf32, #tpu.memory_space<vmem>>, vector<11x22xf32>
    %cst_14 = arith.constant dense<0.000000e+00> : vector<11x128xf32>
    %16 = tpu.matmul %15, %14, %cst_14 {dimension_numbers = #tpu.dot_dimension_numbers<[1], [0], [0], [1], [0, 0, 1, 1], [], []>} : vector<11x22xf32>, vector<22x128xf32>, vector<11x128xf32> -> vector<11x128xf32>
    %c0_15 = arith.constant 0 : index
    %c0_16 = arith.constant 0 : index
    %17 = vector.load %arg7[%c0_15, %c0_16] : memref<11x1xf32, #tpu.memory_space<vmem>>, vector<11x1xf32>
    %18 = vector.broadcast %17 : vector<11x1xf32> to vector<11x128xf32>
    %19 = arith.addf %16, %18 : vector<11x128xf32>
    %cst_17 = arith.constant 0.000000e+00 : f32
    %20 = vector.broadcast %cst_17 : f32 to vector<11x128xf32>
    %21 = arith.maximumf %19, %20 : vector<11x128xf32>
    %c0_18 = arith.constant 0 : index
    %c0_19 = arith.constant 0 : index
    %22 = vector.load %arg8[%c0_18, %c0_19] : memref<1x11xf32, #tpu.memory_space<vmem>>, vector<1x11xf32>
    %cst_20 = arith.constant dense<0.000000e+00> : vector<1x128xf32>
    %23 = tpu.matmul %22, %21, %cst_20 {dimension_numbers = #tpu.dot_dimension_numbers<[1], [0], [0], [1], [0, 0, 1, 1], [], []>} : vector<1x11xf32>, vector<11x128xf32>, vector<1x128xf32> -> vector<1x128xf32>
    %c0_21 = arith.constant 0 : index
    %c0_22 = arith.constant 0 : index
    %24 = vector.load %arg9[%c0_21, %c0_22] : memref<1x1xf32, #tpu.memory_space<vmem>>, vector<1x1xf32>
    %25 = vector.broadcast %24 : vector<1x1xf32> to vector<1x128xf32>
    %26 = arith.addf %23, %25 : vector<1x128xf32>
    %c0_23 = arith.constant 0 : index
    %c0_24 = arith.constant 0 : index
    %27 = vector.load %arg10[%c0_23, %c0_24] : memref<1x128xf32, #tpu.memory_space<vmem>>, vector<1x128xf32>
    tpu.vector_store %arg10[%c0_23, %c0_24], %26 {strides = array<i32>} : memref<1x128xf32, #tpu.memory_space<vmem>>, vector<1x128xf32>,
    return
  }
  func.func @transform_0(%arg0: i32) -> (i32, i32) {
    %c0_i32 = arith.constant 0 : i32
    %c0_i32_0 = arith.constant 0 : i32
    return %c0_i32, %arg0 : i32, i32
  }
  func.func @transform_1(%arg0: i32) -> (i32, i32) {
    %c0_i32 = arith.constant 0 : i32
    %c0_i32_0 = arith.constant 0 : i32
    %c0_i32_1 = arith.constant 0 : i32
    return %c0_i32, %c0_i32_0 : i32, i32
  }
  func.func @transform_2(%arg0: i32) -> (i32, i32) {
    %c0_i32 = arith.constant 0 : i32
    %c0_i32_0 = arith.constant 0 : i32
    %c0_i32_1 = arith.constant 0 : i32
    return %c0_i32, %c0_i32_0 : i32, i32
  }
  func.func @transform_3(%arg0: i32) -> (i32, i32) {
    %c0_i32 = arith.constant 0 : i32
    %c0_i32_0 = arith.constant 0 : i32
    %c0_i32_1 = arith.constant 0 : i32
    return %c0_i32, %c0_i32_0 : i32, i32
  }
  func.func @transform_4(%arg0: i32) -> (i32, i32) {
    %c0_i32 = arith.constant 0 : i32
    %c0_i32_0 = arith.constant 0 : i32
    %c0_i32_1 = arith.constant 0 : i32
    return %c0_i32, %c0_i32_0 : i32, i32
  }
  func.func @transform_5(%arg0: i32) -> (i32, i32) {
    %c0_i32 = arith.constant 0 : i32
    %c0_i32_0 = arith.constant 0 : i32
    %c0_i32_1 = arith.constant 0 : i32
    return %c0_i32, %c0_i32_0 : i32, i32
  }
  func.func @transform_6(%arg0: i32) -> (i32, i32) {
    %c0_i32 = arith.constant 0 : i32
    %c0_i32_0 = arith.constant 0 : i32
    %c0_i32_1 = arith.constant 0 : i32
    return %c0_i32, %c0_i32_0 : i32, i32
  }
  func.func @transform_7(%arg0: i32) -> (i32, i32) {
    %c0_i32 = arith.constant 0 : i32
    %c0_i32_0 = arith.constant 0 : i32
    %c0_i32_1 = arith.constant 0 : i32
    return %c0_i32, %c0_i32_0 : i32, i32
  }
  func.func @transform_8(%arg0: i32) -> (i32, i32) {
    %c0_i32 = arith.constant 0 : i32
    %c0_i32_0 = arith.constant 0 : i32
    %c0_i32_1 = arith.constant 0 : i32
    return %c0_i32, %c0_i32_0 : i32, i32
  }
  func.func @transform_9(%arg0: i32) -> (i32, i32) {
    %c0_i32 = arith.constant 0 : i32
    %c0_i32_0 = arith.constant 0 : i32
    return %c0_i32, %arg0 : i32, i32
  }
}

</mosaic_0001>

<bundles_post_ra>
// kernel: tpu_custom_call.1
= control target key start
LH: loop header
LB: loop body
LE: loop exit
PB: predicated region body
PF: predicated region fallthrough
CT: control target
= control target key end

     0   :  { %s800_s0 = inlined_call_operand.vmem [shape: f32[16,128], index: 0, kind: input, shape index: {}]   ;;  %s801_s1 = inlined_call_operand.vmem [shape: f32[44,16], index: 1, kind: input, shape index: {}]   ;;  %s802_s2 = inlined_call_operand.vmem [shape: f32[44,1], index: 2, kind: input, shape index: {}]   ;;  %s803_s3 = inlined_call_operand.vmem [shape: f32[22,44], index: 3, kind: input, shape index: {}]   ;;  %s804_s4 = inlined_call_operand.vmem [shape: f32[22,1], index: 4, kind: input, shape index: {}]   ;;  %s805_s5 = inlined_call_operand.vmem [shape: f32[11,22], index: 5, kind: input, shape index: {}]   ;;  %s806_s6 = inlined_call_operand.vmem [shape: f32[11,1], index: 6, kind: input, shape index: {}]   ;;  %s807_s7 = inlined_call_operand.vmem [shape: f32[1,11], index: 7, kind: input, shape index: {}]   ;;  %s808_s8 = inlined_call_operand.<no memory space> [shape: f32[1,1], index: 8, kind: input, shape index: {}]   ;;  %s809_s9 = inlined_call_operand.hbm [shape: f32[1,128], index: 9, kind: output, shape index: {}]  }
   0x1   :  { %v14_v0 = vstv %s808_s8 }
   0x2   :  { %15 = vst [vmem:[#allocation2] sm:$0x1] %v14_v0 }
   0x3   :  { %v36_v1 = vld [vmem:[%s800_s0 + $0x8] sm:$0xff]  ;;  %v35_v2 = vld [vmem:[%s800_s0] sm:$0xff]  ;;  %vm79_vm0 = vcmask 130048   ;;  %v641_v5 = vmov 0   ;;  %v39_v7 = vld [vmem:[%s801_s1 + $0x10] sm:$0xff] }
   0x4   :  { %v37_v3 = vld [vmem:[%s801_s1] sm:$0xff]  ;;  %563 = vmatprep.subr.mxu0 %v36_v1  ;;  %v38_v4 = vld [vmem:[%s801_s1 + $0x8] sm:$0xff]  ;;  %617 = vset.pattern.permute.xlu0 %v641_v5  ;;  %v46_v8 = vld [vmem:[%s802_s2 + $0x18] sm:$0xff] }
   0x5   :  { %567 = vmatprep.mubr.msk.f32.mxu0 %vm79_vm0, %v37_v3  ;;  %564 = vmatpush3.msra.mxu0 %v36_v1  ;;  %v48_v6 = vld [vmem:[%s802_s2 + $0x28] sm:$0xf]  ;;  %v47_v9 = vld [vmem:[%s802_s2 + $0x20] sm:$0xff]  ;;  %v40_v10 = vld [vmem:[%s801_s1 + $0x18] sm:$0xff] }
   0x6   :  { %565 = vmatprep.subr.mxu0 %v35_v2  ;;  %76 = vperm.xlu0 %617, %v48_v6   ;;  %v45_v11 = vld [vmem:[%s802_s2 + $0x10] sm:$0xff] }
   0x7   :  { %566 = vmatpush3.msra.mxu0 %v35_v2  ;;  %618 = vset.pattern.permute.xlu1 %v641_v5 }
   0x8   :  { %568 = vmatmul.mubr.msk.f32.vlgmr.msra.gmra.mxu0 %vm79_vm0, %v38_v4  ;;  %66 = vperm.xlu1 %618, %v46_v8  }
   0x9   :  { %570 = vmatprep.mubr.msk.f32.mxu0 %vm79_vm0, %v39_v7 }
   0xa   :  { %16 = vsyncpa [#allocation4], 0  ;;  %v41_v12 = vld [vmem:[%s801_s1 + $0x20] sm:$0xff]  ;;  %71 = vperm.xlu0 %617, %v47_v9   ;;  %v44_v13 = vld [vmem:[%s802_s2 + $0x8] sm:$0xff]  ;;  %v642_v22 = vmov 0.0   ;;  %vm643_vm1 = vmmov 0  }
   0xb   :  { %v42_v14 = vld [vmem:[%s801_s1 + $0x28] sm:$0xf]  ;;  %v43_v15 = vld [vmem:[%s802_s2] sm:$0xff]  ;;  %v204_v16 = vld [vmem:[%s804_s4 + $0x10] sm:$0x3f]  ;;  %576 = vmatprep.subr.mxu1 %v642_v22  ;;  %588 = vmatprep.mubr.msk.f32.mxu1 %vm643_vm1, %v642_v22  ;;  %vm230_vm2 = vcmask 1043456  }
   0xc   :  { %571 = vmatmul.mubr.msk.f32.gmra.mxu0 %vm79_vm0, %v40_v10  ;;  %61 = vperm.xlu1 %618, %v45_v11   ;;  %v203_v17 = vld [vmem:[%s804_s4 + $0x8] sm:$0xff]  ;;  %v202_v18 = vld [vmem:[%s804_s4] sm:$0xff]  ;;  %vm220_vm3 = vcmask 359424   ;;  %v201_v49 = vld [vmem:[%s803_s3 + $0x10] sm:$0x3f]  ;;  %vm331_vm4 = vcmask 179200  }
   0xd   :  { %573 = vmatprep.mubr.msk.f32.mxu0 %vm79_vm0, %v41_v12  ;;  %v320_v19 = vld [vmem:[%s806_s6 + $0x8] sm:$0x7]  ;;  %v319_v20 = vld [vmem:[%s806_s6] sm:$0xff]  ;;  %vm338_vm5 = vcmask 1045504   ;;  %vm434_vm6 = vcmask 1042432   ;;  %vm430_vm7 = vcmask 89088   ;;  %v426_v12 = vlaneseq }
   0xe   :  { %56 = vperm.xlu0 %617, %v44_v13   ;;  %v420_v21 = vld [vmem:[#allocation2] sm:$0x1]  ;;  %v200_v48 = vld [vmem:[%s803_s3 + $0x8] sm:$0xff]  ;;  %s644_s30 = smov [#allocation3]  }
   0xf   :  { %v199_v47 = vld [vmem:[%s803_s3] sm:$0xff]  ;;  %v318_v2 = vld [vmem:[%s805_s5 + $0x8] sm:$0x7]  ;;  %v427_v13 = vshrl.u32 %v426_v12, 7  ;;  %s515_s10 = sshll.u32 %s644_s30, 4  ;;  %s516_s10 = int_to_ptr.vmem [resolvable:$true] %s515_s10 }
  0x10   :  { %574 = vmatmul.mubr.msk.f32.gmra.mxu0 %vm79_vm0, %v42_v14  ;;  %51 = vperm.xlu1 %618, %v43_v15   ;;  %v317_v50 = vld [vmem:[%s805_s5] sm:$0xff]  ;;  %s619_s11 = scalar_lea.vmem %s516_s10, 16  ;;  %p624_p1 = scmp.lt.s32.totalorder %s516_s10, %s516_s10 }
  0x11   :  { %603 = vmatprep.mubr.msk.f32.mxu0 %vm331_vm4, %v317_v50  ;;  %v419_v11 = vld [vmem:[%s807_s7] sm:$0x1]  ;;  %v428_v14 = vsub.s32 0, %v427_v13  ;;  %p620_p0 = scmp.ne.s32.totalorder %s516_s10, %s619_s11  ;;  %s623_s7 = scalar_lea.vmem %s516_s10, 32 }
  0x12   :  { %217 = vperm.xlu0 %617, %v204_v16   ;;  %p625_p2 = scmp.lt.s32.totalorder %s623_s7, %s619_s11 }
  0x14   :  { %212 = vperm.xlu1 %618, %v203_v17   ;;  %p626_p3 = por %p625_p2, %p624_p1 }
  0x16   :  { %207 = vperm.xlu0 %617, %v202_v18   ;;  %p627_p4 = pnand %p626_p3, %p620_p0 }
  0x18   :  { %328 = vperm.xlu1 %618, %v320_v19  }
  0x1a   :  { %323 = vperm.xlu0 %617, %v319_v20  }
  0x1c   :  { %423 = vperm.xlu1 %618, %v420_v21  }
  0x81   :  { %v77_v24 = vpop.permute.xlu0 %76 }
  0x83   :  { %v67_v26 = vpop.permute.xlu1 %66 }
  0x85   :  { %v72_v29 = vpop.permute.xlu0 %71 }
  0x87   :  { %v62_v32 = vpop.permute.xlu1 %61 }
  0x89   :  { %v57_v39 = vpop.permute.xlu0 %56 }
  0x8b   :  { %v52_v42 = vpop.permute.xlu1 %51 }
  0x8d   :  { %v218_v53 = vpop.permute.xlu0 %217 }
  0x8f   :  { %v213_v56 = vpop.permute.xlu1 %212 }
  0x91   :  { %v208_v60 = vpop.permute.xlu0 %207 }
  0x93   :  { %v329_v3 = vpop.permute.xlu1 %328 }
  0x95   :  { %v324_v6 = vpop.permute.xlu0 %323 }
  0x97   :  { %v424_v15 = vpop.permute.xlu1 %423 }
  0x98   :  { %v429_v16 = vrot.slane %v424_v15, %v428_v14 }
  0xc8   :  { %v569_v23 = vpop.f32.mrf.mxu0 }
  0xc9   :  { %v170_v40 = vadd.f32 %v569_v23, %v57_v39 }
  0xca   :  { %v164_v25 = vpop.f32.mrf.mxu0 }
  0xcb   :  { %v165_v43 = vadd.f32 %v164_v25, %v52_v42  ;;  %v194_v45 = vmax.f32 %v170_v40, 0.0 }
  0xcc   :  { %v572_v27 = vpop.f32.mrf.mxu0 }
  0xcd   :  { %v180_v34 = vadd.f32 %v572_v27, %v67_v26  ;;  %v193_v46 = vmax.f32 %v165_v43, 0.0 }
  0xce   :  { %v174_v28 = vpop.f32.mrf.mxu0 }
  0xcf   :  { %v175_v37 = vadd.f32 %v174_v28, %v62_v32  ;;  %v196_v41 = vmax.f32 %v180_v34, 0.0 }
  0xd0   :  { %v575_v30 = vpop.f32.mrf.mxu0 }
  0xd1   :  { %v190_v31 = vadd.f32 %v575_v30, %v77_v24  ;;  %v195_v44 = vmax.f32 %v175_v37, 0.0 }
  0xd2   :  { %v184_v33 = vpop.f32.mrf.mxu0 }
  0xd3   :  { %v198_v35 = vmax.f32 %v190_v31, 0.0  ;;  %v185_v36 = vadd.f32 %v184_v33, %v72_v29 }
  0xd5   :  { %v197_v38 = vmax.f32 %v185_v36, 0.0  ;;  %577 = vmatpush3.msk.msra.mxu1 %vm230_vm2, %v198_v35 }
  0xd6   :  { %578 = vmatprep.subr.mxu1 %v642_v22 }
  0xd7   :  { %579 = vmatpush3.msra.mxu1 %v197_v38 }
  0xd8   :  { %580 = vmatprep.subr.mxu1 %v642_v22 }
  0xd9   :  { %581 = vmatpush3.msra.mxu1 %v196_v41 }
  0xda   :  { %582 = vmatprep.subr.mxu1 %v642_v22 }
  0xdb   :  { %583 = vmatpush3.msra.mxu1 %v195_v44 }
  0xdc   :  { %584 = vmatprep.subr.mxu1 %v642_v22 }
  0xdd   :  { %585 = vmatpush3.msra.mxu1 %v194_v45 }
  0xde   :  { %586 = vmatprep.subr.mxu1 %v642_v22 }
  0xdf   :  { %587 = vmatpush3.msra.mxu1 %v193_v46 }
  0xe0   :  { %589 = vmatmul.mubr.msk.f32.vlgmr.msra.gmra.mxu1 %vm220_vm3, %v199_v47 }
  0xe1   :  { %591 = vmatprep.mubr.msk.f32.mxu1 %vm643_vm1, %v642_v22 }
  0xe4   :  { %592 = vmatmul.mubr.msk.f32.gmra.mxu1 %vm220_vm3, %v200_v48 }
  0xe5   :  { %594 = vmatprep.mubr.msk.f32.mxu1 %vm643_vm1, %v642_v22 }
  0xe8   :  { %595 = vmatmul.mubr.msk.f32.gmra.mxu1 %vm220_vm3, %v201_v49 }
 0x1a0   :  { %v300_v51 = vpop.f32.mrf.mxu1 }
 0x1a1   :  { %v301_v62 = vadd.f32 %v300_v51, %v208_v60 }
 0x1a2   :  { %v590_v52 = vpop.f32.mrf.mxu1 }
 0x1a3   :  { %v314_v1 = vmax.f32 %v301_v62, 0.0 }
 0x1a4   :  { %v305_v54 = vpop.f32.mrf.mxu1 }
 0x1a5   :  { %v306_v58 = vadd.f32 %v305_v54, %v213_v56 }
 0x1a6   :  { %v593_v55 = vpop.f32.mrf.mxu1 }
 0x1a7   :  { %v315_v0 = vmax.f32 %v306_v58, 0.0 }
 0x1a8   :  { %v310_v57 = vpop.f32.mrf.mxu1 }
 0x1a9   :  { %v311_v59 = vadd.f32 %v310_v57, %v218_v53 }
 0x1aa   :  { %v596_v61 = vpop.f32.mrf.mxu1 }
 0x1ab   :  { %v316_v63 = vmax.f32 %v311_v59, 0.0 }
 0x1ad   :  { %597 = vmatprep.subr.msk.mxu0 %vm338_vm5, %v316_v63 }
 0x1ae   :  { %598 = vmatpush3.msk.msra.mxu0 %vm338_vm5, %v316_v63 }
 0x1af   :  { %599 = vmatprep.subr.mxu0 %v315_v0 }
 0x1b0   :  { %600 = vmatpush3.msra.mxu0 %v315_v0 }
 0x1b1   :  { %601 = vmatprep.subr.mxu0 %v314_v1 }
 0x1b2   :  { %602 = vmatpush3.msra.mxu0 %v314_v1 }
 0x1b3   :  { %604 = vmatmul.mubr.msk.f32.vlgmr.msra.gmra.mxu0 %vm331_vm4, %v318_v2  ;;  %606 = vmatprep.subr.mxu0 %v642_v22 }
 0x1b4   :  { %610 = vmatprep.mubr.msk.f32.mxu0 %vm643_vm1, %v642_v22 }
 0x273   :  { %v605_v4 = vpop.f32.mrf.mxu0 }
 0x274   :  { %v414_v5 = vadd.f32 %v605_v4, %v329_v3 }
 0x275   :  { %v408_v7 = vpop.f32.mrf.mxu0 }
 0x276   :  { %v418_v8 = vmax.f32 %v414_v5, 0.0  ;;  %v409_v9 = vadd.f32 %v408_v7, %v324_v6 }
 0x278   :  { %v417_v10 = vmax.f32 %v409_v9, 0.0  ;;  %607 = vmatpush3.msk.msra.mxu0 %vm434_vm6, %v418_v8 }
 0x279   :  { %608 = vmatprep.subr.mxu0 %v642_v22 }
 0x27a   :  { %609 = vmatpush3.msra.mxu0 %v417_v10 }
 0x27b   :  { %611 = vmatmul.mubr.msk.f32.vlgmr.msra.gmra.mxu0 %vm430_vm7, %v419_v11 }
 0x33b   :  { %v504_v17 = vpop.f32.mrf.mxu0 }
 0x33c   :  { %v505_v18 = vadd.f32 %v504_v17, %v429_v16 }
 0x33d   :  { %v612_v19 = vpop.f32.mrf.mxu0 }
 0x33e   :  { %508 = vst [vmem:[#allocation3] sm:$0x1] %v505_v18 }
 0x33f   :  { %630 = shalt.err (!%p627_p4)
}
 0x340   :  { %518 = dma.vmem_to_hbm [thread:$0]  %s516_s10, 16, %s809_s9, [#allocation4]  }
 0x341   :  { %639 = dma.done.wait [#allocation4], 16  }
 0x342   :  { %640 = vsyncadd [#allocation4], 4294967280 }
 0x343   :  { %522 = vsyncpa [#allocation4], 1 }

</bundles_post_ra>
